<compile_context>
chip_gen: v5e
topology: v5e:2x2
jax: 0.10.0
libtpu: 0.0.40
codegen_flags: <defaults>
</compile_context>

<pallas_src>
import functools

import jax
import jax.numpy as jnp
from jax.experimental import pallas as pl
from jax.experimental.pallas import tpu as pltpu


def _round_up(x, m):
    return (x + m - 1) // m * m


def _vmem_capacity_bytes():
    """Best-effort per-core VMEM query; fall back to the smallest part (v7x, 64 MiB)."""
    try:
        return int(pltpu.get_tpu_info().vmem_capacity_bytes)
    except Exception:
        return 64 * 1024 * 1024


def patch_embed_kernel(p_ref, w_ref, b_ref, o_ref):
    # p_ref: [TM, K] streaming tile of flattened patches (compute dtype, bf16)
    # w_ref: [K,  E] VMEM-resident projection weight (compute dtype)
    # b_ref: [1,  E] VMEM-resident bias (f32)
    # o_ref: [TM, E] output tile
    acc = jnp.dot(p_ref[...], w_ref[...], preferred_element_type=jnp.float32)
    o_ref[...] = (acc + b_ref[...]).astype(o_ref.dtype)


def patch_embedding(x, weight, bias, patch_size, *,
                    compute_dtype=jnp.bfloat16, out_dtype=None, tm_max=1024):
    """x: [B, C, H, W] (NCHW). weight: [E, C, ph, pw]. bias: [E].

    Returns [B, num_patches, E]  ==  proj(x).flatten(2).transpose(1, 2).
    """
    B, C, H, W = x.shape
    ph, pw = patch_size
    E = weight.shape[0]
    assert H % ph == 0 and W % pw == 0, "image size must be divisible by patch size"
    gh, gw = H // ph, W // pw
    num_patches = gh * gw
    out_dtype = x.dtype if out_dtype is None else out_dtype

    # --- patch extraction (im2col), one fused XLA convert+transpose pass:
    #     read x (original dtype) -> write bf16 [M, K] patches, which the kernel
    #     then streams.  See TODO(synk) above about eliminating this pass.
    xc = x.astype(compute_dtype)
    patches = xc.reshape(B, C, gh, ph, gw, pw)
    patches = patches.transpose(0, 2, 4, 1, 3, 5)          # [B, gh, gw, C, ph, pw]
    patches = patches.reshape(B * num_patches, C * ph * pw)
    M, K = patches.shape

    # Conv2d weight [E, C, ph, pw] flattens channel-major to [E, K] -> [K, E];
    # this matches the (c, p, q) ordering of the patch flatten above.
    w_mat = weight.reshape(E, K).T.astype(compute_dtype)
    b_mat = bias.reshape(1, E).astype(jnp.float32)

    in_item = jnp.dtype(compute_dtype).itemsize
    out_item = jnp.dtype(out_dtype).itemsize

    # --- VMEM budget / tile sizing --------------------------------------------
    # Resident weight + bias (constant index_map -> DMA'd once; accounted with
    # the runtime's conservative 2x buffering).
    resident_bytes = 2 * (K * E * in_item + E * 4)
    # Streaming patch + output tiles are double-buffered by the pipeline.
    per_row_bytes = 2 * (K * in_item + E * out_item)

    capacity = _vmem_capacity_bytes()
    budget = min((capacity * 3) // 4, 96 * 1024 * 1024)    # ~48 MiB on 64-MiB v7x parts

    if M <= 16:
        tm = M                                             # single full-extent block
    else:
        tm_fit = max(16, (budget - resident_bytes - (4 << 20)) // per_row_bytes)
        tm_fit = (tm_fit // 16) * 16                       # bf16 packs 2 rows / sublane
        # >= 2 grid steps so the "parallel" axis can shard across v7x's 2 TCs.
        tm_half = _round_up(-(-M // 2), 16)
        tm = max(16, min(tm_max, tm_fit, tm_half))
    grid = (pl.cdiv(M, tm),)

    vmem_need = resident_bytes + tm * per_row_bytes + (4 << 20)
    vmem_limit = int(min(max(vmem_need, 32 * 1024 * 1024), budget))

    # Kernel-only HBM traffic with per-array itemsizes (the im2col pass is a
    # separate XLA op and is costed by XLA itself).
    cost = pl.CostEstimate(
        flops=2 * M * K * E,
        transcendentals=0,
        bytes_accessed=(M * K * in_item            # streamed patch tiles
                        + K * E * in_item + E * 4  # resident weight + bias
                        + M * E * out_item),       # output tiles
    )

    out = pl.pallas_call(
        patch_embed_kernel,
        out_shape=jax.ShapeDtypeStruct((M, E), out_dtype),
        grid=grid,
        in_specs=[
            pl.BlockSpec((tm, K), lambda i: (i, 0)),   # patch tiles stream
            pl.BlockSpec((K, E), lambda i: (0, 0)),    # weight resident (fetched once)
            pl.BlockSpec((1, E), lambda i: (0, 0)),    # bias resident (fetched once)
        ],
        out_specs=pl.BlockSpec((tm, E), lambda i: (i, 0)),
        compiler_params=pltpu.CompilerParams(
            dimension_semantics=("parallel",),
            vmem_limit_bytes=vmem_limit,
        ),
        cost_estimate=cost,
    )(patches, w_mat, b_mat)

    return out.reshape(B, num_patches, E)


if __name__ == "__main__":
    # Small config consistent with the module: img_size=16, patch_size=4,
    # in_channel=4, embedding_dim=32 -> num_patches = (16/4)^2 = 16.
    B, C, H, W = 2, 4, 16, 16
    ph = pw = 4
    E = 32

    key = jax.random.PRNGKey(0)
    kx, kw, kb = jax.random.split(key, 3)

    x = jax.random.normal(kx, (B, C, H, W), dtype=jnp.float32)
    weight = jax.random.normal(kw, (E, C, ph, pw), dtype=jnp.float32) * 0.02
    bias = jax.random.normal(kb, (E,), dtype=jnp.float32) * 0.02

    fn = jax.jit(functools.partial(patch_embedding, patch_size=(ph, pw)))
    out = jax.block_until_ready(fn(x, weight, bias))

    # Reference: stride==kernel Conv2d (NCHW/OIHW) with the same bf16 operand
    # cast + f32 accumulation as the kernel, then flatten(2).transpose(1, 2).
    ref = jax.lax.conv_general_dilated(
        x.astype(jnp.bfloat16), weight.astype(jnp.bfloat16),
        window_strides=(ph, pw), padding="VALID",
        dimension_numbers=("NCHW", "OIHW", "NCHW"),
        preferred_element_type=jnp.float32)
    ref = ref + bias.reshape(1, E, 1, 1)
    ref = ref.reshape(B, E, -1).transpose(0, 2, 1).astype(x.dtype)

    assert out.shape == (B, (H // ph) * (W // pw), E)
    assert out.dtype == x.dtype
    max_err = float(jnp.max(jnp.abs(out - ref)))
    assert jnp.allclose(out, ref, atol=2e-2, rtol=2e-2), f"max_err={max_err}"

    print("KERNEL_OK")
</pallas_src>

<mosaic_0001>
module attributes {stable_mosaic.version = 11 : i64} {
  func.func @patch_embed_kernel(%arg0: i32, %arg1: memref<16x64xbf16, #tpu.memory_space<vmem>>, %arg2: memref<64x32xbf16, #tpu.memory_space<vmem>>, %arg3: memref<1x32xf32, #tpu.memory_space<vmem>>, %arg4: memref<16x32xf32, #tpu.memory_space<vmem>>) attributes {dimension_semantics = [#tpu.dimension_semantics<parallel>], iteration_bounds = array<i64: 2>, scalar_prefetch = 0 : i64, scratch_operands = 0 : i64, tpu.core_type = #tpu.core_type<tc>, window_params = [{transform_indices = @transform_0, window_bounds = array<i64: 16, 64>}, {pipeline_mode = #tpu.pipeline_mode<synchronous>, transform_indices = @transform_1, window_bounds = array<i64: 64, 32>}, {pipeline_mode = #tpu.pipeline_mode<synchronous>, transform_indices = @transform_2, window_bounds = array<i64: 1, 32>}, {transform_indices = @transform_3, window_bounds = array<i64: 16, 32>}]} {
    %c0 = arith.constant 0 : index
    %c0_0 = arith.constant 0 : index
    %0 = vector.load %arg1[%c0, %c0_0] : memref<16x64xbf16, #tpu.memory_space<vmem>>, vector<16x64xbf16>
    %c0_1 = arith.constant 0 : index
    %c0_2 = arith.constant 0 : index
    %1 = vector.load %arg2[%c0_1, %c0_2] : memref<64x32xbf16, #tpu.memory_space<vmem>>, vector<64x32xbf16>
    %cst = arith.constant dense<0.000000e+00> : vector<16x32xf32>
    %2 = tpu.matmul %0, %1, %cst {dimension_numbers = #tpu.dot_dimension_numbers<[1], [0], [0], [1], [0, 0, 1, 1], [], []>} : vector<16x64xbf16>, vector<64x32xbf16>, vector<16x32xf32> -> vector<16x32xf32>
    %c0_3 = arith.constant 0 : index
    %c0_4 = arith.constant 0 : index
    %3 = vector.load %arg3[%c0_3, %c0_4] : memref<1x32xf32, #tpu.memory_space<vmem>>, vector<1x32xf32>
    %4 = vector.broadcast %3 : vector<1x32xf32> to vector<16x32xf32>
    %5 = arith.addf %2, %4 : vector<16x32xf32>
    %c0_5 = arith.constant 0 : index
    %c0_6 = arith.constant 0 : index
    %6 = vector.load %arg4[%c0_5, %c0_6] : memref<16x32xf32, #tpu.memory_space<vmem>>, vector<16x32xf32>
    tpu.vector_store %arg4[%c0_5, %c0_6], %5 {strides = array<i32>} : memref<16x32xf32, #tpu.memory_space<vmem>>, vector<16x32xf32>,
    return
  }
  func.func @transform_0(%arg0: i32) -> (i32, i32) {
    %c0_i32 = arith.constant 0 : i32
    %c0_i32_0 = arith.constant 0 : i32
    return %arg0, %c0_i32 : i32, i32
  }
  func.func @transform_1(%arg0: i32) -> (i32, i32) {
    %c0_i32 = arith.constant 0 : i32
    %c0_i32_0 = arith.constant 0 : i32
    %c0_i32_1 = arith.constant 0 : i32
    return %c0_i32, %c0_i32_0 : i32, i32
  }
  func.func @transform_2(%arg0: i32) -> (i32, i32) {
    %c0_i32 = arith.constant 0 : i32
    %c0_i32_0 = arith.constant 0 : i32
    %c0_i32_1 = arith.constant 0 : i32
    return %c0_i32, %c0_i32_0 : i32, i32
  }
  func.func @transform_3(%arg0: i32) -> (i32, i32) {
    %c0_i32 = arith.constant 0 : i32
    %c0_i32_0 = arith.constant 0 : i32
    return %arg0, %c0_i32 : i32, i32
  }
}

</mosaic_0001>

<bundles_post_ra>
// kernel: patch_embedding.1
= control target key start
LH: loop header
LB: loop body
LE: loop exit
PB: predicated region body
PF: predicated region fallthrough
CT: control target
= control target key end

     0   :  { %8 = vsyncpa [#allocation3], 0  ;;  %s581_s0 = inlined_call_operand.vmem [shape: bf16[32,64], index: 0, kind: input, shape index: {}]   ;;  %s582_s1 = inlined_call_operand.vmem [shape: bf16[64,32], index: 1, kind: input, shape index: {}]   ;;  %s583_s2 = inlined_call_operand.vmem [shape: f32[1,32], index: 2, kind: input, shape index: {}]   ;;  %s584_s3 = inlined_call_operand.hbm [shape: f32[32,32], index: 3, kind: output, shape index: {}]  }
   0x1   :  { %10 = vsyncpa [#allocation3 + $0x1], 0  ;;  %s482_s12 = smov 0   ;;  %s484_s13 = smov 0  }
   0x2   :  { %s486_s14 = smov 0   ;;  %s488_s15 = smov 0  }
   0x3 LB: > { %s503_s16 = sadd.s32 4294967295, %s458_s15   ;;  %s315_s17 = sadd.s32 4294967294, %s458_s15   ;;  %s458_s15 = sphi %s488_s15, %s590_s15   ;;  %s454_s14 = sphi %s486_s14, %s589_s14   ;;  %s450_s13 = sphi %s484_s13, %s588_s13   ;;  %s446_s12 = sphi %s482_s12, %s587_s12  }
   0x4   : > { %s507_s18 = sadd.s32 1, %s458_s15   ;;  %s91_s19 = sadd.s32 1, %s454_s14 }
   0x5   : > { %s88_s20 = ssub.s32 %s458_s15, %s507_s18  ;;  %p101_p0 = scmp.ne.s32.totalorder %s454_s14, %s450_s13 }
   0x6   : > { %p89_p1 = scmp.eq.s32.totalorder %s88_s20, 0  ;;  %p102_p2 = scmp.eq.s32.totalorder %s503_s16, 1 }
   0x7   : > { %p107_p3 = scmp.ne.s32.totalorder %s450_s13, %s446_s12  ;;  %p108_p4 = scmp.eq.s32.totalorder %s315_s17, 1 }
   0x8   : > { %s518_s21 = scalar_select %p89_p1, %s454_s14, %s91_s19  }
   0x9   : > { %p520_p5 = por %p102_p2, %p101_p0  ;;  %p524_p6 = por %p108_p4, %p107_p3 }
   0xa   : > { %p318_p7 = scmp.ge.s32.totalorder %s458_s15, 1  ;;  %p141_p8 = scmp.lt.s32.totalorder %s458_s15, 3 }
   0xc   : > { %p142_p9 = pnand %p318_p7, %p141_p8 }
   0xd   : > { %s320_s26 = sshll.u32 (!%p142_p9), %s503_s16, 1  ;;  %s162_s10 = sand.u32 (!%p142_p9), 1, %s450_s13  }
   0xe   : > { %145 = sbr.rel (%p142_p9) target bundleno = 175 (0xaf), region = 32  ;;  %p166_p10 = scmp.lt.s32.totalorder (!%p142_p9), %s320_s26, 3 }
   0xf   : > { %s319_s11 = sshll.u32 (!%p142_p9), %s162_s10, 4  ;;  %s353_s20 = sshll.u32 (!%p142_p9), %s503_s16, 4 }
  0x10   : > { %s164_s27 = scalar_lea.vmem (!%p142_p9), [#allocation2], %s319_s11  ;;  %s238_s30 = scalar_lea.sflag (!%p142_p9), [#allocation3], %s162_s10 }
  0x11   : > { %s250_s28 = sshll.u32 (!%p142_p9), %s164_s27, 4  ;;  %s416_s7 = scalar_lea.hbm (!%p142_p9), %s584_s3, 32  ;;  %s251_s28 = int_to_ptr.vmem [resolvable:$true] %s250_s28 }
  0x13   : > { %v352_v0 = vld [vmem:[%s582_s1 + $0x18] sm:$0xff]  ;;  %v351_v1 = vld [vmem:[%s582_s1 + $0x10] sm:$0xff]  ;;  %s592_s26 = smov (!%p166_p10, %s320_s26), 3  ;;  %v350_v2 = vld [vmem:[%s582_s1 + $0x8] sm:$0xff]  ;;  %vm216_vm0 = vcmask 523264   ;;  %vm234_vm1 = vcmask 261120  }
  0x14   : > { %224 = vmatpush.bf16.msra.mxu0 %v352_v0  ;;  %s321_s4 = sshll.u32 %s592_s26, 2  ;;  %v349_v3 = vld [vmem:[%s582_s1] sm:$0xff]  ;;  %s249_s26 = scalar_lea.hbm %s584_s3, %s353_s20 }
  0x15   : > { %s169_s9 = scalar_lea.vmem %s581_s0, %s321_s4  ;;  %v395_v5 = vld [vmem:[%s583_s2] ss:$0 sm:$0xff]  ;;  %s252_s29 = sshll.u32 %s249_s26, 4  ;;  %s253_s29 = int_to_ptr.hbm [resolvable:$true] %s252_s29 }
  0x16   : > { %v348_v4 = vld [vmem:[%s169_s9] sm:$0xff]  ;;  %s410_s4 = sshra.s32 %s253_s29, 4  ;;  %s411_s4 = int_to_ptr.hbm [resolvable:$true] %s410_s4 }
  0x17   : > { %s412_s16 = scalar_lea.hbm %s411_s4, 16  ;;  %p417_p0 = scmp.lt.s32.totalorder %s411_s4, %s584_s3 }
  0x18   : > { %225 = vmatpush.bf16.msra.mxu0 %v351_v1  ;;  %p413_p11 = scmp.ne.s32.totalorder %s411_s4, %s412_s16  ;;  %p418_p1 = scmp.lt.s32.totalorder %s416_s7, %s412_s16 }
  0x1a   : > { %p414_p12 = pnand %p413_p11, %p520_p5  ;;  %p419_p2 = por %p418_p1, %p417_p0 }
  0x1c   : > { %226 = vmatpush.bf16.msra.mxu0 %v350_v2  ;;  %p415_p13 = pneg %p414_p12 }
  0x1e   : > { %p420_p3 = pnand %p419_p2, %p415_p13 }
  0x20   : > { %227 = vmatpush.bf16.msra.mxu0 %v349_v3 }
  0x23   : > { %342 = vmatmul.msk.bf16.vlgmr.msra.gmra.mxu0 %vm216_vm0, %v348_v4 }
  0xa0   : > { %v229_v6 = vpop.f32.mrf.mxu0 }
  0xa1   : > { %v230_v7 = vadd.f32 %v395_v5, %v229_v6 }
  0xa3   : > { %235 = vst.msk [vmem:[%s164_s27] sm:$0xff] %vm234_vm1, %v230_v7 }
  0xa8   : > { %v231_v8 = vpop.f32.mrf.mxu0 }
  0xa9   : > { %v232_v9 = vadd.f32 %v395_v5, %v231_v8 }
  0xab   : > { %236 = vst.msk [vmem:[%s164_s27 + $0x8] sm:$0xff] %vm234_vm1, %v232_v9 }
  0xac   : > { %423 = shalt.err (!%p420_p3)
}
  0xad   : > { %s460_s10 = smov 128   ;;  %s461_s11 = smov 8  }
  0xae   : > { %354 = dma.vmem_to_hbm [thread:$0]  (%p520_p5), %s251_s28, 256, %s253_s29, %s238_s30, %s460_s10, %s460_s10, %s461_s11  }
  0xaf PF: > { %p360_p4 = scmp.ge.s32.totalorder %s458_s15, 2  ;;  %s267_s17 = sand.u32 1, %s446_s12  }
  0xb0   : > { %s268_s19 = scalar_lea.sflag [#allocation3], %s267_s17 }
  0xb1   : > { %p357_p7 = pnand %p360_p4, %p524_p6 }
  0xb3   : > { %p358_p8 = pneg %p357_p7 }
  0xb5   : > { %441 = dma.done.wait (%p358_p8), %s268_s19, 256  }
  0xb6   : > { %443 = vsyncadd (%p358_p8), %s268_s19, 4294967040  ;;  %p13_p9 = scmp.ge.s32.totalorder %s507_s18, 4   ;;  %s587_s12 = smov %s450_s13 }
  0xb7   : > { %s588_s13 = smov %s454_s14  ;;  %s589_s14 = smov %s518_s21 }
  0xb8   : > { %s590_s15 = smov %s507_s18  ;;  %15 = sbr.rel (!%p13_p9) target bundleno = 3 (0x3), region = 67 }
  0xbd   :  { %274 = vsyncpa [#allocation3], 1 }
  0xbe   :  { %276 = vsyncpa [#allocation3 + $0x1], 1 }

</bundles_post_ra>
